<compile_context>
chip_gen: v5e
topology: v5e:2x2
jax: 0.10.0
libtpu: 0.0.40
codegen_flags: <defaults>
</compile_context>

<pallas_src>
import jax
import jax.numpy as jnp
from jax.experimental import pallas as pl
from jax.experimental.pallas import tpu as pltpu


def head_kernel(x_ref, wlin_ref, blin_ref, y_ref, feat_ref):
    # x_ref   : (TB, C, HW) f32   (HW on the 128-lane axis)
    # wlin_ref: (C, K) f32        (pre-transposed in the wrapper)
    # blin_ref: (1, K) f32
    x = x_ref[...]
    inv_hw = 1.0 / x.shape[-1]                    # compile-time constant

    # --- feature = global average pool over spatial positions (lane reduce) ---
    feat = jnp.sum(x, axis=-1) * inv_hw           # (TB, C), f32 accumulation
    feat_ref[...] = feat

    # --- y = last_linear(feature) ---
    y_ref[...] = (
        jnp.dot(feat, wlin_ref[...], preferred_element_type=jnp.float32)
        + blin_ref[...]
    )


def _pick_batch_tile(B, C, HW, budget_bytes=8 * 1024 * 1024):
    """Largest power-of-two multiple of 8 dividing B whose double-buffered
    f32 x-tile stays under `budget_bytes`; small batches run in one block."""
    if B <= 8 or B % 8 != 0:
        return B
    tb = 8
    while (B % (tb * 2) == 0) and (tb * 2) * C * HW * 4 * 2 <= budget_bytes:
        tb *= 2
    return tb


def model_head(x_nchw, w_cam, b_cam, w_lin, b_lin):
    """x_nchw: (B, C, H, W) backbone feature map. Returns (y, feature).

    w_cam / b_cam are accepted for API parity with the PyTorch module but are
    unused: `cam_feature` does not appear in the returned outputs.
    """
    del w_cam, b_cam  # dead branch (see performance notes)

    B, C, H, W = x_nchw.shape
    K = w_lin.shape[0]
    HW = H * W

    # NCHW -> (B, C, HW): free contiguous reshape, no transpose. HW lands on
    # the lane axis for the pooling reduction.
    x_bch = x_nchw.reshape(B, C, HW)

    # Pre-transpose the linear weight once, outside the kernel.
    w_lin_t = jnp.transpose(w_lin, (1, 0))        # (C, K)
    b_lin2 = b_lin.reshape(1, K)

    TB = _pick_batch_tile(B, C, HW)
    grid = (B // TB,)

    grid_spec = pltpu.PrefetchScalarGridSpec(
        num_scalar_prefetch=0,
        grid=grid,
        in_specs=[
            pl.BlockSpec((TB, C, HW), lambda b: (b, 0, 0)),   # x tile
            pl.BlockSpec((C, K), lambda b: (0, 0)),           # w_lin^T (resident)
            pl.BlockSpec((1, K), lambda b: (0, 0)),           # bias (resident)
        ],
        out_specs=(
            pl.BlockSpec((TB, K), lambda b: (b, 0)),          # y
            pl.BlockSpec((TB, C), lambda b: (b, 0)),          # feature
        ),
    )

    y, feature = pl.pallas_call(
        head_kernel,
        out_shape=(
            jax.ShapeDtypeStruct((B, K), jnp.float32),        # y
            jax.ShapeDtypeStruct((B, C), jnp.float32),        # feature
        ),
        grid_spec=grid_spec,
        compiler_params=pltpu.CompilerParams(
            dimension_semantics=("parallel",),
            vmem_limit_bytes=32 * 1024 * 1024,
        ),
    )(x_bch, w_lin_t, b_lin2)

    return y, feature


if __name__ == "__main__":
    # Small, deterministic shapes: B=2, nc=32 (backbone num_features stand-in),
    # spatial 16x16, num_classes=2.
    B, C, H, W, K = 2, 32, 16, 16, 2

    key = jax.random.PRNGKey(0)
    kx, kwc, kbc, kwl, kbl = jax.random.split(key, 5)

    x = jax.random.normal(kx, (B, C, H, W), dtype=jnp.float32)          # NCHW feature map
    w_cam = jax.random.normal(kwc, (K, C, 1, 1), dtype=jnp.float32) * 0.05
    b_cam = jax.random.normal(kbc, (K,), dtype=jnp.float32) * 0.05
    w_lin = jax.random.normal(kwl, (K, C), dtype=jnp.float32) * 0.05
    b_lin = jax.random.normal(kbl, (K,), dtype=jnp.float32) * 0.05

    y, feature = model_head(x, w_cam, b_cam, w_lin, b_lin)
    jax.block_until_ready((y, feature))

    # Pure-JAX reference check of the head.
    feat_ref = jnp.mean(x, axis=(2, 3))                                 # (B, C)
    y_ref = feat_ref @ w_lin.T + b_lin
    assert jnp.allclose(feature, feat_ref, atol=1e-5, rtol=1e-5)
    assert jnp.allclose(y, y_ref, atol=1e-5, rtol=1e-5)

    print("KERNEL_OK")
</pallas_src>

<mosaic_0001>
module attributes {stable_mosaic.version = 11 : i64} {
  func.func @head_kernel(%arg0: i32, %arg1: memref<2x32x256xf32, #tpu.memory_space<vmem>>, %arg2: memref<32x2xf32, #tpu.memory_space<vmem>>, %arg3: memref<1x2xf32, #tpu.memory_space<vmem>>, %arg4: memref<2x2xf32, #tpu.memory_space<vmem>>, %arg5: memref<2x32xf32, #tpu.memory_space<vmem>>) attributes {dimension_semantics = [#tpu.dimension_semantics<parallel>], iteration_bounds = array<i64: 1>, scalar_prefetch = 0 : i64, scratch_operands = 0 : i64, tpu.core_type = #tpu.core_type<tc>, window_params = [{transform_indices = @transform_0, window_bounds = array<i64: 2, 32, 256>}, {pipeline_mode = #tpu.pipeline_mode<synchronous>, transform_indices = @transform_1, window_bounds = array<i64: 32, 2>}, {pipeline_mode = #tpu.pipeline_mode<synchronous>, transform_indices = @transform_2, window_bounds = array<i64: 1, 2>}, {transform_indices = @transform_3, window_bounds = array<i64: 2, 2>}, {transform_indices = @transform_4, window_bounds = array<i64: 2, 32>}]} {
    %c0 = arith.constant 0 : index
    %c0_0 = arith.constant 0 : index
    %c0_1 = arith.constant 0 : index
    %0 = vector.load %arg1[%c0, %c0_0, %c0_1] : memref<2x32x256xf32, #tpu.memory_space<vmem>>, vector<2x32x256xf32>
    %cst = arith.constant dense<0.000000e+00> : vector<2x32xf32>
    %1 = vector.multi_reduction <add>, %0, %cst [2] : vector<2x32x256xf32> to vector<2x32xf32>
    %cst_2 = arith.constant 3.906250e-03 : f32
    %2 = vector.broadcast %cst_2 : f32 to vector<2x32xf32>
    %3 = arith.mulf %1, %2 : vector<2x32xf32>
    %c0_3 = arith.constant 0 : index
    %c0_4 = arith.constant 0 : index
    %4 = vector.load %arg5[%c0_3, %c0_4] : memref<2x32xf32, #tpu.memory_space<vmem>>, vector<2x32xf32>
    tpu.vector_store %arg5[%c0_3, %c0_4], %3 {strides = array<i32>} : memref<2x32xf32, #tpu.memory_space<vmem>>, vector<2x32xf32>,
    %c0_5 = arith.constant 0 : index
    %c0_6 = arith.constant 0 : index
    %5 = vector.load %arg2[%c0_5, %c0_6] : memref<32x2xf32, #tpu.memory_space<vmem>>, vector<32x2xf32>
    %cst_7 = arith.constant dense<0.000000e+00> : vector<2x2xf32>
    %6 = tpu.matmul %3, %5, %cst_7 {dimension_numbers = #tpu.dot_dimension_numbers<[1], [0], [0], [1], [0, 0, 1, 1], [], []>} : vector<2x32xf32>, vector<32x2xf32>, vector<2x2xf32> -> vector<2x2xf32>
    %c0_8 = arith.constant 0 : index
    %c0_9 = arith.constant 0 : index
    %7 = vector.load %arg3[%c0_8, %c0_9] : memref<1x2xf32, #tpu.memory_space<vmem>>, vector<1x2xf32>
    %8 = vector.broadcast %7 : vector<1x2xf32> to vector<2x2xf32>
    %9 = arith.addf %6, %8 : vector<2x2xf32>
    %c0_10 = arith.constant 0 : index
    %c0_11 = arith.constant 0 : index
    %10 = vector.load %arg4[%c0_10, %c0_11] : memref<2x2xf32, #tpu.memory_space<vmem>>, vector<2x2xf32>
    tpu.vector_store %arg4[%c0_10, %c0_11], %9 {strides = array<i32>} : memref<2x2xf32, #tpu.memory_space<vmem>>, vector<2x2xf32>,
    return
  }
  func.func @transform_0(%arg0: i32) -> (i32, i32, i32) {
    %c0_i32 = arith.constant 0 : i32
    %c0_i32_0 = arith.constant 0 : i32
    %c0_i32_1 = arith.constant 0 : i32
    return %arg0, %c0_i32, %c0_i32_0 : i32, i32, i32
  }
  func.func @transform_1(%arg0: i32) -> (i32, i32) {
    %c0_i32 = arith.constant 0 : i32
    %c0_i32_0 = arith.constant 0 : i32
    %c0_i32_1 = arith.constant 0 : i32
    return %c0_i32, %c0_i32_0 : i32, i32
  }
  func.func @transform_2(%arg0: i32) -> (i32, i32) {
    %c0_i32 = arith.constant 0 : i32
    %c0_i32_0 = arith.constant 0 : i32
    %c0_i32_1 = arith.constant 0 : i32
    return %c0_i32, %c0_i32_0 : i32, i32
  }
  func.func @transform_3(%arg0: i32) -> (i32, i32) {
    %c0_i32 = arith.constant 0 : i32
    %c0_i32_0 = arith.constant 0 : i32
    return %arg0, %c0_i32 : i32, i32
  }
  func.func @transform_4(%arg0: i32) -> (i32, i32) {
    %c0_i32 = arith.constant 0 : i32
    %c0_i32_0 = arith.constant 0 : i32
    return %arg0, %c0_i32 : i32, i32
  }
}

</mosaic_0001>

<bundles_post_ra>
// kernel: tpu_custom_call.1
= control target key start
LH: loop header
LB: loop body
LE: loop exit
PB: predicated region body
PF: predicated region fallthrough
CT: control target
= control target key end

     0   :  { %10 = vsyncpa [#allocation3], 0  ;;  %s322_s0 = inlined_call_operand.hbm [shape: f32[2,32,256], index: 0, kind: input, shape index: {}]   ;;  %s323_s1 = inlined_call_operand.vmem [shape: f32[32,2], index: 1, kind: input, shape index: {}]   ;;  %s324_s2 = inlined_call_operand.vmem [shape: f32[1,2], index: 2, kind: input, shape index: {}]   ;;  %s325_s3 = inlined_call_operand.hbm [shape: f32[2,2], index: 3, kind: output, shape index: {0}]   ;;  %s326_s4 = inlined_call_operand.hbm [shape: f32[2,32], index: 4, kind: output, shape index: {1}]  }
   0x1   :  { %11 = vsyncpa [#allocation4], 0 }
   0x2   :  { %12 = vsyncpa [#allocation7], 0  ;;  %s17_s17 = sshll.u32 %s322_s0, 4  ;;  %s268_s18 = smov [#allocation2]   ;;  %s18_s17 = int_to_ptr.hbm [resolvable:$true] %s17_s17 }
   0x3   :  { %s19_s19 = sshll.u32 %s268_s18, 4  ;;  %s269_s20 = smov 256   ;;  %s20_s19 = int_to_ptr.vmem [resolvable:$true] %s19_s19 }
   0x4   :  { %s270_s21 = smov 16  }
   0x5   :  { %25 = dma.hbm_to_vmem [thread:$0]  %s18_s17, 2048, %s20_s19, [#allocation3], %s269_s20, %s269_s20, %s270_s21  }
   0x6   :  { %262 = dma.done.wait [#allocation3], 2048  }
   0x7   :  { %263 = vsyncadd [#allocation3], 4294965248  ;;  %v42_v0 = vld [vmem:[#allocation2 + $0x40] sm:$0xff]  ;;  %v43_v1 = vld [vmem:[#allocation2 + $0x48] sm:$0xff]  ;;  %v90_v31 = vlaneseq  ;;  %vm95_vm0 = vcmask 130112   ;;  %vm99_vm1 = vcmask 195712  }
   0x8   :  { %v34_v2 = vld [vmem:[#allocation2] sm:$0xff]  ;;  %v62_v3 = vadd.f32 %v43_v1, %v42_v0  ;;  %v35_v4 = vld [vmem:[#allocation2 + $0x8] sm:$0xff]  ;;  %v44_v9 = vld [vmem:[#allocation2 + $0x50] sm:$0xff]  ;;  %vm103_vm2 = vcmask 261312   ;;  %vm112_vm3 = vcmask 1041409   ;;  %vm125_vm4 = vcmask 261120  }
   0x9   :  { %v38_v5 = vld [vmem:[#allocation2 + $0x20] sm:$0xff]  ;;  %v39_v6 = vld [vmem:[#allocation2 + $0x28] sm:$0xff]  ;;  %v50_v7 = vadd.f32 %v35_v4, %v34_v2  ;;  %v45_v10 = vld [vmem:[#allocation2 + $0x58] sm:$0xff]  ;;  %v91_v32 = vand.u32 127, %v90_v31  ;;  %vm115_vm5 = vcmask 254976   ;;  %s168_s6 = sshll.u32 %s326_s4, 4  ;;  %s169_s6 = int_to_ptr.hbm [resolvable:$true] %s168_s6 }
   0xa   :  { %v56_v8 = vadd.f32 %v39_v6, %v38_v5  ;;  %63 = vadd.xlane.f32.xlu1 %v62_v3  ;;  %v36_v11 = vld [vmem:[#allocation2 + $0x10] sm:$0xff]  ;;  %v37_v12 = vld [vmem:[#allocation2 + $0x18] sm:$0xff]  ;;  %v46_v13 = vld [vmem:[#allocation2 + $0x60] sm:$0xff]  ;;  %v65_v15 = vadd.f32 %v45_v10, %v44_v9  ;;  %s272_s9 = smov [#allocation5]   ;;  %s157_s13 = sshll.u32 %s325_s3, 4  ;;  %vm148_vm6 = vcmask 9216   ;;  %s158_s13 = int_to_ptr.hbm [resolvable:$true] %s157_s13 }
   0xb   :  { %51 = vadd.xlane.f32.xlu0 %v50_v7  ;;  %v47_v14 = vld [vmem:[#allocation2 + $0x68] sm:$0xff]  ;;  %v53_v16 = vadd.f32 %v37_v12, %v36_v11  ;;  %v48_v18 = vld [vmem:[#allocation2 + $0x70] sm:$0xff]  ;;  %v49_v19 = vld [vmem:[#allocation2 + $0x78] sm:$0xff]  ;;  %v93_v34 = vadd.s32 4294967288, %v91_v32  ;;  %v97_v43 = vadd.s32 4294967280, %v91_v32  ;;  %v101_v47 = vadd.s32 4294967272, %v91_v32 }
   0xc   :  { %57 = vadd.xlane.f32.xlu2 %v56_v8  ;;  %v68_v17 = vadd.f32 %v47_v14, %v46_v13  ;;  %v40_v20 = vld [vmem:[#allocation2 + $0x30] sm:$0xff]  ;;  %v41_v21 = vld [vmem:[#allocation2 + $0x38] sm:$0xff]  ;;  %v71_v22 = vadd.f32 %v49_v19, %v48_v18  ;;  %v118_v26 = vld [vmem:[%s323_s1 + $0x8] sm:$0xff]  ;;  %s155_s10 = sshll.u32 %s272_s9, 4  ;;  %s156_s10 = int_to_ptr.vmem [resolvable:$true] %s155_s10 }
   0xd   :  { %v59_v23 = vadd.f32 %v41_v21, %v40_v20  ;;  %v120_v24 = vld [vmem:[%s323_s1 + $0x18] sm:$0xff]  ;;  %v119_v25 = vld [vmem:[%s323_s1 + $0x10] sm:$0xff]  ;;  %v117_v27 = vld [vmem:[%s323_s1] sm:$0xff]  ;;  %s271_s1 = smov [#allocation6]  }
   0xe   :  { %140 = vmatpush.msra.mxu0 %v120_v24  ;;  %s166_s29 = sshll.u32 %s271_s1, 4  ;;  %v189_v0 = vld [vmem:[%s324_s2] ss:$0 sm:$0xff]  ;;  %s167_s29 = int_to_ptr.vmem [resolvable:$true] %s166_s29 }
  0x10   :  { %141 = vmatpush.msra.mxu0 %v119_v25 }
  0x12   :  { %66 = vadd.xlane.f32.xlu1 %v65_v15  ;;  %142 = vmatpush.msra.mxu0 %v118_v26 }
  0x13   :  { %54 = vadd.xlane.f32.xlu0 %v53_v16 }
  0x14   :  { %69 = vadd.xlane.f32.xlu2 %v68_v17  ;;  %143 = vmatpush.msra.mxu0 %v117_v27 }
  0x1a   :  { %72 = vadd.xlane.f32.xlu1 %v71_v22 }
  0x1b   :  { %60 = vadd.xlane.f32.xlu0 %v59_v23 }
  0x7d   :  { %v64_v28 = vpop.xlane.xlu1 %63 }
  0x7e   :  { %v52_v29 = vpop.xlane.xlu0 %51  ;;  %v78_v39 = vmul.f32 0.00390625, %v64_v28 }
  0x7f   :  { %v58_v30 = vpop.xlane.xlu2 %57  ;;  %v74_v40 = vmul.f32 0.00390625, %v52_v29 }
  0x80   :  { %v105_v45 = vperm.slane %v78_v39, %v91_v32  ;;  %v76_v46 = vmul.f32 0.00390625, %v58_v30 }
  0x81   :  { %v92_v48 = vperm.slane %v74_v40, %v91_v32 }
  0x82   :  { %v98_v56 = vperm.slane %v76_v46, %v97_v43 }
  0x85   :  { %v67_v33 = vpop.xlane.xlu1 %66 }
  0x86   :  { %v79_v35 = vmul.f32 0.00390625, %v67_v33  ;;  %v55_v36 = vpop.xlane.xlu0 %54 }
  0x87   :  { %v70_v37 = vpop.xlane.xlu2 %69  ;;  %v75_v38 = vmul.f32 0.00390625, %v55_v36 }
  0x88   :  { %v80_v41 = vmul.f32 0.00390625, %v70_v37  ;;  %v106_v42 = vperm.slane %v79_v35, %v93_v34 }
  0x89   :  { %v94_v44 = vperm.slane %v75_v38, %v93_v34 }
  0x8a   :  { %v108_v49 = vperm.slane %v80_v41, %v97_v43  ;;  %v107_v51 = vsel %vm95_vm0, %v106_v42, %v105_v45 }
  0x8b   :  { %v96_v54 = vsel %vm95_vm0, %v94_v44, %v92_v48 }
  0x8c   :  { %v109_v59 = vsel %vm99_vm1, %v108_v49, %v107_v51  ;;  %v100_v60 = vsel %vm99_vm1, %v98_v56, %v96_v54 }
  0x8d   :  { %v73_v50 = vpop.xlane.xlu1 %72 }
  0x8e   :  { %v81_v52 = vmul.f32 0.00390625, %v73_v50  ;;  %v61_v53 = vpop.xlane.xlu0 %60 }
  0x8f   :  { %v77_v55 = vmul.f32 0.00390625, %v61_v53 }
  0x90   :  { %v110_v57 = vperm.slane %v81_v52, %v101_v47 }
  0x91   :  { %v102_v58 = vperm.slane %v77_v55, %v101_v47 }
  0x92   :  { %v111_v61 = vsel %vm103_vm2, %v110_v57, %v109_v59 }
  0x93   :  { %v104_v62 = vsel %vm103_vm2, %v102_v58, %v100_v60 }
  0x94   :  { %v113_v63 = vsel %vm112_vm3, %v111_v61, %v104_v62 }
  0x95   :  { %183 = vmatmul.msk.f32.vlgmr.msra.gmra.mxu0 %vm125_vm4, %v113_v63  ;;  %116 = vst.msk [vmem:[#allocation6] sm:$0x3] %vm115_vm5, %v113_v63 }
  0x96   :  { %171 = dma.vmem_to_hbm [thread:$0]  %s167_s29, 32, %s169_s6, [#allocation7]  }
 0x112   :  { %v145_v1 = vpop.f32.mrf.mxu0 }
 0x113   :  { %v146_v2 = vadd.f32 %v189_v0, %v145_v1 }
 0x115   :  { %149 = vst.msk [vmem:[#allocation5] sm:$0x3] %vm148_vm6, %v146_v2 }
 0x116   :  { %160 = dma.vmem_to_hbm [thread:$0]  %s156_s10, 32, %s158_s13, [#allocation4]  }
 0x117   :  { %264 = dma.done.wait [#allocation4], 32  }
 0x118   :  { %265 = vsyncadd [#allocation4], 4294967264 }
 0x119   :  { %266 = dma.done.wait [#allocation7], 32  }
 0x11a   :  { %267 = vsyncadd [#allocation7], 4294967264 }
 0x11b   :  { %180 = vsyncpa [#allocation3], 1 }
 0x11c   :  { %181 = vsyncpa [#allocation4], 1 }
 0x11d   :  { %182 = vsyncpa [#allocation7], 1 }

</bundles_post_ra>
